<compile_context>
chip_gen: v7x
topology: tpu7x:2x2x1
jax: 0.10.0
libtpu: 0.0.40
codegen_flags: <defaults>
</compile_context>

<pallas_src>
import numpy as np
import jax
import jax.numpy as jnp
from jax.experimental import pallas as pl
from jax.experimental.pallas import tpu as pltpu


def _build_lowpass_operator(H, W, D0=10.0):
    """Dense operator equivalent (per 2-D slice) to
         ifft2( ifftshift( fftshift(fft2(x)) * gaussian_low ) ).
    (The fftshift/ifftshift the reference applies over the batch/channel dims cancel
    because the gaussian filter is broadcast over those dims.)
    Returns the TRANSPOSED [real | imag] concatenation, shape (HW, 2*HW), so the kernel
    applies the whole chain with a single `x_flat @ McatT` matmul.
    NOTE: for large H, W this dense (HW, HW) form should be replaced by its separable
    (H,H)/(W,W) factorization; at 16x16 the dense bf16 operator is only 256 KiB and maps
    to one well-shaped MXU matmul.
    """
    # TODO(synk): no FFT primitive exists in Pallas; FFT/iFFT are realized as an
    # equivalent precomputed DFT-as-matmul linear operator applied inside the kernel.
    yy, zz = np.meshgrid(np.arange(H), np.arange(W), indexing="ij")
    cy, cz = (H - 1) // 2, (W - 1) // 2
    dis = (yy - cy) ** 2 + (zz - cz) ** 2
    low = np.exp(-dis / (2.0 * D0 ** 2))            # gaussian low-pass (shifted domain)
    G = np.fft.ifftshift(low)                       # filter in unshifted frequency domain
    k = np.arange(H)
    l = np.arange(W)
    FH = np.exp(-2j * np.pi * np.outer(k, k) / H)   # forward DFT matrix (H, H)
    FW = np.exp(-2j * np.pi * np.outer(l, l) / W)   # forward DFT matrix (W, W)
    # M4[m,n,h,w] = (1/HW) sum_{k,l} conj(FH)[m,k] G[k,l] conj(FW)[n,l] FH[k,h] FW[l,w]
    P = np.einsum("nl,lw->nlw", FW.conj(), FW)
    Q = np.einsum("kl,nlw->knw", G, P)
    R = np.einsum("mk,kh->mkh", FH.conj(), FH)
    M4 = np.einsum("mkh,knw->mnhw", R, Q) / (H * W)
    Mmat = M4.reshape(H * W, H * W)
    McatT = np.concatenate([Mmat.real.T, Mmat.imag.T], axis=1)   # (HW, 2*HW)
    return np.asarray(McatT, np.float32)


def fsm_fft_kernel(x_ref, mcat_ref, wa_ref, wc_ref, o_ref):
    # x_ref: (C, HW) f32      mcat_ref: (HW, 2*HW) bf16
    # wa_ref: (C, C) f32      wc_ref: (Co, C) bf16        o_ref: (Co, HW) f32
    x = x_ref[...]
    C, HW = x.shape

    # Low-frequency reconstruction: one fused bf16 MXU matmul gives [real | imag].
    spec = jnp.dot(x.astype(jnp.bfloat16), mcat_ref[...],
                   preferred_element_type=jnp.float32)            # (C, 2*HW) f32
    fr = spec[:, :HW]                                             # 128-lane aligned views
    fi = spec[:, HW:]
    mag = jnp.sqrt(fr * fr + fi * fi)                             # |ifft2(...)| in f32

    # AdaptiveAvgPool over spatial -> conv_atten (1x1, no bias) -> sigmoid gate.
    y = jnp.sum(mag, axis=-1, keepdims=True) * (1.0 / HW)         # (C, 1)
    z = jnp.dot(wa_ref[...], y, preferred_element_type=jnp.float32)
    s = jax.nn.sigmoid(z)                                         # (C, 1)

    # Gate the input and apply the final 1x1 conv (C -> Co).
    feat = x * s                                                  # (C, HW) f32
    out = jnp.dot(wc_ref[...], feat.astype(jnp.bfloat16),
                  preferred_element_type=jnp.float32)             # (Co, HW) f32
    o_ref[...] = out.astype(o_ref.dtype)


def fsm_fft_wo_skip(x, McatT_bf16, Wa, Wc_bf16):
    B, C, H, Wd = x.shape
    HW = H * Wd
    Co = Wc_bf16.shape[0]
    xf = x.reshape(B, C, HW)
    out = pl.pallas_call(
        fsm_fft_kernel,
        out_shape=jax.ShapeDtypeStruct((B, Co, HW), x.dtype),
        grid=(B,),
        in_specs=[
            pl.BlockSpec((pl.Squeezed(), C, HW), lambda b: (b, 0, 0)),  # x slab for batch b
            pl.BlockSpec((HW, 2 * HW), lambda b: (0, 0)),               # fused [Re|Im] op^T (bf16)
            pl.BlockSpec((C, C), lambda b: (0, 0)),                     # conv_atten weight (f32)
            pl.BlockSpec((Co, C), lambda b: (0, 0)),                    # final conv weight (bf16)
        ],
        out_specs=pl.BlockSpec((pl.Squeezed(), Co, HW), lambda b: (b, 0, 0)),
        compiler_params=pltpu.CompilerParams(dimension_semantics=("parallel",)),
    )(xf, McatT_bf16, Wa, Wc_bf16)
    return out.reshape(B, Co, H, Wd)


def reference(x, Wa, Wc, D0=10.0):
    """Pure-JAX mirror of the PyTorch forward (low_flag=True)."""
    B, C, H, Wd = x.shape
    freq = jnp.fft.fft2(x)
    freq_shift = jnp.fft.fftshift(freq)                       # all dims, like torch
    yy, zz = jnp.meshgrid(jnp.arange(H), jnp.arange(Wd), indexing="ij")
    cy, cz = (H - 1) // 2, (Wd - 1) // 2
    dis = (yy - cy) ** 2 + (zz - cz) ** 2
    low = jnp.exp(-dis / (2.0 * D0 ** 2))
    low_shift = freq_shift * low
    low_x = jnp.abs(jnp.fft.ifft2(jnp.fft.ifftshift(low_shift)))
    y = low_x.mean(axis=(2, 3))                               # avg_pool2d -> (B, C)
    atten = jax.nn.sigmoid(y @ Wa.T)                          # conv_atten 1x1, no bias
    feat = x * atten[:, :, None, None]
    out = jnp.einsum("oc,bchw->bohw", Wc, feat)               # conv 1x1, no bias
    return out


if __name__ == "__main__":
    B, C, H, W = 2, 32, 16, 16
    Co = 32

    key = jax.random.PRNGKey(0)
    kx, ka, kc = jax.random.split(key, 3)
    x = jax.random.normal(kx, (B, C, H, W), dtype=jnp.float32)

    # kaiming_normal_(a=1) on bias-free 1x1 convs  ->  std = 1/sqrt(fan_in)
    Wa = jax.random.normal(ka, (C, C), jnp.float32) * (1.0 / np.sqrt(C))
    Wc = jax.random.normal(kc, (Co, C), jnp.float32) * (1.0 / np.sqrt(C))

    # Host-precomputed fused spectral operator, shipped to the kernel in bf16.
    McatT = jnp.asarray(_build_lowpass_operator(H, W, D0=10.0), dtype=jnp.bfloat16)
    Wc_bf16 = Wc.astype(jnp.bfloat16)

    out = fsm_fft_wo_skip(x, McatT, Wa, Wc_bf16)
    out = jax.block_until_ready(out)

    ref = reference(x, Wa, Wc)
    np.testing.assert_allclose(np.asarray(out), np.asarray(ref), rtol=5e-2, atol=5e-2)
    print("KERNEL_OK")
</pallas_src>

<mosaic_0001>
module attributes {stable_mosaic.version = 11 : i64} {
  func.func @fsm_fft_kernel(%arg0: i32, %arg1: memref<1x32x256xf32, #tpu.memory_space<vmem>>, %arg2: memref<256x512xbf16, #tpu.memory_space<vmem>>, %arg3: memref<32x32xf32, #tpu.memory_space<vmem>>, %arg4: memref<32x32xbf16, #tpu.memory_space<vmem>>, %arg5: memref<1x32x256xf32, #tpu.memory_space<vmem>>) attributes {dimension_semantics = [#tpu.dimension_semantics<parallel>], iteration_bounds = array<i64: 2>, scalar_prefetch = 0 : i64, scratch_operands = 0 : i64, tpu.core_type = #tpu.core_type<tc>, window_params = [{transform_indices = @transform_0, window_bounds = array<i64: 1, 32, 256>}, {pipeline_mode = #tpu.pipeline_mode<synchronous>, transform_indices = @transform_1, window_bounds = array<i64: 256, 512>}, {pipeline_mode = #tpu.pipeline_mode<synchronous>, transform_indices = @transform_2, window_bounds = array<i64: 32, 32>}, {pipeline_mode = #tpu.pipeline_mode<synchronous>, transform_indices = @transform_3, window_bounds = array<i64: 32, 32>}, {transform_indices = @transform_4, window_bounds = array<i64: 1, 32, 256>}]} {
    %c0 = arith.constant 0 : index
    %c0_0 = arith.constant 0 : index
    %c0_1 = arith.constant 0 : index
    %0 = vector.load %arg1[%c0, %c0_0, %c0_1] : memref<1x32x256xf32, #tpu.memory_space<vmem>>, vector<1x32x256xf32>
    %1 = vector.shape_cast %0 : vector<1x32x256xf32> to vector<32x256xf32>
    %2 = arith.truncf %1 : vector<32x256xf32> to vector<32x256xbf16>
    %c0_2 = arith.constant 0 : index
    %c0_3 = arith.constant 0 : index
    %3 = vector.load %arg2[%c0_2, %c0_3] : memref<256x512xbf16, #tpu.memory_space<vmem>>, vector<256x512xbf16>
    %cst = arith.constant dense<0.000000e+00> : vector<32x512xf32>
    %4 = tpu.matmul %2, %3, %cst {dimension_numbers = #tpu.dot_dimension_numbers<[1], [0], [0], [1], [0, 0, 1, 1], [], []>} : vector<32x256xbf16>, vector<256x512xbf16>, vector<32x512xf32> -> vector<32x512xf32>
    %5 = vector.extract_strided_slice %4 {offsets = [0, 0], sizes = [32, 256], strides = [1, 1]} : vector<32x512xf32> to vector<32x256xf32>
    %6 = vector.extract_strided_slice %4 {offsets = [0, 256], sizes = [32, 256], strides = [1, 1]} : vector<32x512xf32> to vector<32x256xf32>
    %7 = arith.mulf %5, %5 : vector<32x256xf32>
    %8 = arith.mulf %6, %6 : vector<32x256xf32>
    %9 = arith.addf %7, %8 : vector<32x256xf32>
    %10 = math.sqrt %9 : vector<32x256xf32>
    %cst_4 = arith.constant dense<0.000000e+00> : vector<32xf32>
    %11 = vector.multi_reduction <add>, %10, %cst_4 [1] : vector<32x256xf32> to vector<32xf32>
    %12 = vector.shape_cast %11 : vector<32xf32> to vector<32x1xf32>
    %cst_5 = arith.constant 3.906250e-03 : f32
    %13 = vector.broadcast %cst_5 : f32 to vector<32x1xf32>
    %14 = arith.mulf %12, %13 : vector<32x1xf32>
    %c0_6 = arith.constant 0 : index
    %c0_7 = arith.constant 0 : index
    %15 = vector.load %arg3[%c0_6, %c0_7] : memref<32x32xf32, #tpu.memory_space<vmem>>, vector<32x32xf32>
    %cst_8 = arith.constant dense<0.000000e+00> : vector<32x1xf32>
    %16 = tpu.matmul %15, %14, %cst_8 {dimension_numbers = #tpu.dot_dimension_numbers<[1], [0], [0], [1], [0, 0, 1, 1], [], []>} : vector<32x32xf32>, vector<32x1xf32>, vector<32x1xf32> -> vector<32x1xf32>
    %17 = arith.negf %16 : vector<32x1xf32>
    %18 = math.exp %17 : vector<32x1xf32>
    %cst_9 = arith.constant 1.000000e+00 : f32
    %19 = vector.broadcast %cst_9 : f32 to vector<32x1xf32>
    %20 = arith.addf %19, %18 : vector<32x1xf32>
    %21 = arith.divf %19, %20 : vector<32x1xf32>
    %22 = vector.broadcast %21 : vector<32x1xf32> to vector<32x256xf32>
    %23 = arith.mulf %1, %22 : vector<32x256xf32>
    %c0_10 = arith.constant 0 : index
    %c0_11 = arith.constant 0 : index
    %24 = vector.load %arg4[%c0_10, %c0_11] : memref<32x32xbf16, #tpu.memory_space<vmem>>, vector<32x32xbf16>
    %25 = arith.truncf %23 : vector<32x256xf32> to vector<32x256xbf16>
    %cst_12 = arith.constant dense<0.000000e+00> : vector<32x256xf32>
    %26 = tpu.matmul %24, %25, %cst_12 {dimension_numbers = #tpu.dot_dimension_numbers<[1], [0], [0], [1], [0, 0, 1, 1], [], []>} : vector<32x32xbf16>, vector<32x256xbf16>, vector<32x256xf32> -> vector<32x256xf32>
    %c0_13 = arith.constant 0 : index
    %c0_14 = arith.constant 0 : index
    %c0_15 = arith.constant 0 : index
    %27 = vector.load %arg5[%c0_13, %c0_14, %c0_15] : memref<1x32x256xf32, #tpu.memory_space<vmem>>, vector<1x32x256xf32>
    %28 = vector.shape_cast %27 : vector<1x32x256xf32> to vector<32x256xf32>
    %29 = vector.shape_cast %26 : vector<32x256xf32> to vector<1x32x256xf32>
    tpu.vector_store %arg5[%c0_13, %c0_14, %c0_15], %29 {strides = array<i32>} : memref<1x32x256xf32, #tpu.memory_space<vmem>>, vector<1x32x256xf32>,
    return
  }
  func.func @transform_0(%arg0: i32) -> (i32, i32, i32) {
    %c0_i32 = arith.constant 0 : i32
    %c0_i32_0 = arith.constant 0 : i32
    %c0_i32_1 = arith.constant 0 : i32
    return %arg0, %c0_i32, %c0_i32_0 : i32, i32, i32
  }
  func.func @transform_1(%arg0: i32) -> (i32, i32) {
    %c0_i32 = arith.constant 0 : i32
    %c0_i32_0 = arith.constant 0 : i32
    %c0_i32_1 = arith.constant 0 : i32
    return %c0_i32, %c0_i32_0 : i32, i32
  }
  func.func @transform_2(%arg0: i32) -> (i32, i32) {
    %c0_i32 = arith.constant 0 : i32
    %c0_i32_0 = arith.constant 0 : i32
    %c0_i32_1 = arith.constant 0 : i32
    return %c0_i32, %c0_i32_0 : i32, i32
  }
  func.func @transform_3(%arg0: i32) -> (i32, i32) {
    %c0_i32 = arith.constant 0 : i32
    %c0_i32_0 = arith.constant 0 : i32
    %c0_i32_1 = arith.constant 0 : i32
    return %c0_i32, %c0_i32_0 : i32, i32
  }
  func.func @transform_4(%arg0: i32) -> (i32, i32, i32) {
    %c0_i32 = arith.constant 0 : i32
    %c0_i32_0 = arith.constant 0 : i32
    %c0_i32_1 = arith.constant 0 : i32
    return %arg0, %c0_i32, %c0_i32_0 : i32, i32, i32
  }
}

</mosaic_0001>

<bundles_post_ra>
// kernel: tpu_custom_call.1
= control target key start
LH: loop header
LB: loop body
LE: loop exit
PB: predicated region body
PF: predicated region fallthrough
CT: control target
= control target key end

     0   :  { %9 = vsyncpa [#allocation3], 0  ;;  %s2135_s0 = inlined_call_operand.hbm [shape: f32[2,32,256], index: 0, kind: input, shape index: {}]   ;;  %s2136_s1 = inlined_call_operand.hbm [shape: bf16[256,512], index: 1, kind: input, shape index: {}]   ;;  %s2137_s2 = inlined_call_operand.hbm [shape: f32[32,32], index: 2, kind: input, shape index: {}]   ;;  %s2138_s3 = inlined_call_operand.hbm [shape: bf16[32,32], index: 3, kind: input, shape index: {}]   ;;  %s2139_s4 = inlined_call_operand.hbm [shape: f32[2,32,256], index: 4, kind: output, shape index: {}]  }
   0x1   :  { %11 = vsyncpa [#allocation3 + $0x1], 0 }
   0x2   :  { %12 = vsyncpa [#allocation6], 0 }
   0x3   :  { %13 = vsyncpa [#allocation9], 0 }
   0x4   :  { %14 = vsyncpa [#allocation4], 0 }
   0x5   :  { %16 = vsyncpa [#allocation4 + $0x1], 0  ;;  %s1789_s15 = smov 0   ;;  %s1791_s16 = smov 0  }
   0x6   :  { %s1793_s17 = smov 0   ;;  %s1795_s18 = smov 0  }
   0x7 LB: > { %s1810_s19 = sadd.s32 4294967295, %s1748_s18   ;;  %s1214_s20 = sadd.s32 4294967294, %s1748_s18   ;;  %s1748_s18 = sphi %s1795_s18, %s2162_s18   ;;  %s1744_s17 = sphi %s1793_s17, %s2161_s17   ;;  %s1740_s16 = sphi %s1791_s16, %s2160_s16   ;;  %s1736_s15 = sphi %s1789_s15, %s2159_s15  }
   0x8   : > { %p42_p0 = scmp.ne.s32.totalorder %s1740_s16, %s1736_s15  ;;  %p2140_p1 = scmp.eq.s32.totalorder %s1810_s19, 0 }
   0x9   : > { %p135_p3 = scmp.eq.s32.totalorder %s1214_s20, 1  ;;  %p1215_p5 = scmp.ge.s32.totalorder %s1748_s18, 1 }
   0xa   : > { %p1819_p4 = por %p2140_p1, %p42_p0  ;;  %p142_p7 = scmp.lt.s32.totalorder %s1748_s18, 3 }
   0xb   : > { %p1824_p6 = por %p135_p3, %p42_p0  ;;  %s1750_s24 = smov [#allocation5]  }
   0xc   : > { %s2143_s21 = scalar_select %p1819_p4, 1, 0 }
   0xd   : > { %s2144_s22 = scalar_select %p1824_p6, 1, 0 }
   0xe   : > { %p1829_p8 = pnand %p1215_p5, %p142_p7  ;;  %s154_s25 = sshll.u32 %s1750_s24, 4  ;;  %s1833_s25 = int_to_ptr.vmem [resolvable:$true] %s154_s25 }
   0xf   : > { %s1751_s27 = smov [#allocation7]   ;;  %s1560_s5 = scalar_lea.hbm %s2136_s1, 8192 }
  0x10   : > { %s2145_s23 = scalar_select %p1829_p8, 1, 0 }
  0x11   : > { %p1358_p9 = pneg %p1829_p8  ;;  %s167_s28 = sshll.u32 %s1751_s27, 4  ;;  %s1844_s28 = int_to_ptr.vmem [resolvable:$true] %s167_s28 }
  0x12   : > { %p1561_p12 = scmp.ne.s32.totalorder %s2136_s1, %s1560_s5  ;;  %p1567_p5 = scmp.lt.u32.totalorder %s1560_s5, %s2136_s1 }
  0x13   : > { %p1840_p11 = pnand %p1358_p9, %p2140_p1 }
  0x15   : > { %p1854_p13 = pneg %p1840_p11 }
  0x17   : > { %p1563_p0 = pnand %p1854_p13, %p1561_p12 }
  0x19   : > { %p1564_p3 = pneg %p1563_p0 }
  0x1b   : > { %p1569_p7 = pnand %p1567_p5, %p1564_p3 }
  0x1d   : > { %1572 = shalt.err (!%p1569_p7)
}
  0x1e   : > { %s1573_s11 = scalar_lea.vmem %s1833_s25, 8192  ;;  %p1581_p2 = scmp.lt.s32.totalorder %s1833_s25, %s1833_s25 }
  0x1f   : > { %p1574_p9 = scmp.ne.s32.totalorder %s1833_s25, %s1573_s11  ;;  %p1582_p6 = scmp.lt.s32.totalorder %s1573_s11, %s1573_s11 }
  0x21   : > { %p1576_p10 = pnand %p1574_p9, %p1854_p13  ;;  %p1583_p12 = por %p1582_p6, %p1581_p2 }
  0x23   : > { %p1577_p1 = pneg %p1576_p10 }
  0x25   : > { %p1584_p0 = pnand %p1583_p12, %p1577_p1 }
  0x27   : > { %1587 = shalt.err (!%p1584_p0)
}
  0x28   : > { %s1752_s12 = smov 256   ;;  %s1753_s13 = smov 16  }
  0x29   : > { %1361 = dma.hbm_to_vmem [thread:$0]  (!%p1840_p11), %s2136_s1, 8192, %s1833_s25, [#allocation6], %s1752_s12, %s1752_s12, %s1753_s13  }
  0x2a   : > { %s1588_s29 = scalar_lea.hbm %s2137_s2, 512 }
  0x2b   : > { %p1589_p1 = scmp.ne.s32.totalorder %s2137_s2, %s1588_s29  ;;  %p1595_p10 = scmp.lt.u32.totalorder %s1588_s29, %s2137_s2 }
  0x2d   : > { %p1591_p2 = pnand %p1589_p1, %p1854_p13 }
  0x2f   : > { %p1592_p6 = pneg %p1591_p2 }
  0x31   : > { %p1597_p3 = pnand %p1595_p10, %p1592_p6 }
  0x33   : > { %1600 = shalt.err (!%p1597_p3)
}
  0x34   : > { %s1601_s25 = scalar_lea.vmem %s1844_s28, 512  ;;  %p1609_p12 = scmp.lt.s32.totalorder %s1844_s28, %s1844_s28 }
  0x35   : > { %p1602_p5 = scmp.ne.s32.totalorder %s1844_s28, %s1601_s25  ;;  %p1610_p0 = scmp.lt.s32.totalorder %s1601_s25, %s1601_s25 }
  0x37   : > { %p1604_p7 = pnand %p1602_p5, %p1854_p13  ;;  %p1611_p1 = por %p1610_p0, %p1609_p12 }
  0x39   : > { %p1605_p9 = pneg %p1604_p7 }
  0x3b   : > { %p1612_p2 = pnand %p1611_p1, %p1605_p9 }
  0x3d   : > { %1615 = shalt.err (!%p1612_p2)
}
  0x3e   : > { %s1754_s9 = smov 128   ;;  %s1755_s10 = smov 8  }
  0x3f   : > { %1364 = dma.hbm_to_vmem [thread:$0]  (!%p1840_p11), %s2137_s2, 512, %s1844_s28, [#allocation6], %s1754_s9, %s1754_s9, %s1755_s10  }
  0x40   : > { %s1756_s20 = smov [#allocation8]   ;;  %s1616_s30 = scalar_lea.hbm %s2138_s3, 256 }
  0x41   : > { %s180_s24 = sshll.u32 %s1756_s20, 4  ;;  %p1617_p6 = scmp.ne.s32.totalorder %s2138_s3, %s1616_s30  ;;  %s181_s24 = int_to_ptr.vmem [resolvable:$true] %s180_s24 }
  0x42   : > { %p1623_p5 = scmp.lt.u32.totalorder %s1616_s30, %s2138_s3 }
  0x43   : > { %p1619_p10 = pnand %p1617_p6, %p1854_p13 }
  0x45   : > { %p1620_p3 = pneg %p1619_p10 }
  0x47   : > { %p1625_p7 = pnand %p1623_p5, %p1620_p3 }
  0x49   : > { %1628 = shalt.err (!%p1625_p7)
}
  0x4a   : > { %s1629_s28 = scalar_lea.vmem %s181_s24, 256  ;;  %p1637_p1 = scmp.lt.s32.totalorder %s181_s24, %s181_s24 }
  0x4b   : > { %p1630_p9 = scmp.ne.s32.totalorder %s181_s24, %s1629_s28  ;;  %p1638_p2 = scmp.lt.s32.totalorder %s1629_s28, %s1629_s28 }
  0x4d   : > { %p1632_p12 = pnand %p1630_p9, %p1854_p13  ;;  %p1639_p4 = por %p1638_p2, %p1637_p1 }
  0x4f   : > { %p1633_p0 = pneg %p1632_p12 }
  0x51   : > { %p1640_p8 = pnand %p1639_p4, %p1633_p0 }
  0x53   : > { %1643 = shalt.err (!%p1640_p8)
}
  0x54   : > { %s1757_s9 = smov 64   ;;  %s1758_s8 = smov 4  }
  0x55   : > { %1367 = dma.hbm_to_vmem [thread:$0]  (!%p1840_p11), %s2138_s3, 256, %s181_s24, [#allocation9], %s1757_s9, %s1757_s9, %s1758_s8  }
  0x56   : > { %s1920_s14 = sadd.s32 1, %s1748_s18   ;;  %s29_s27 = sadd.s32 1, %s1744_s17 }
  0x57   : > { %s26_s20 = ssub.s32 %s1748_s18, %s1920_s14  ;;  %p36_p8 = scmp.ne.s32.totalorder %s1744_s17, %s1740_s16 }
  0x58   : > { %p27_p4 = scmp.eq.s32.totalorder %s26_s20, 0  ;;  %p37_p13 = scmp.eq.s32.totalorder %s1748_s18, 0 }
  0x59   : > { %p1379_p6 = scmp.lt.s32.totalorder %s1748_s18, 2  ;;  %p2148_p3 = scmp.eq.s32.totalorder %s1810_s19, 1 }
  0x5a   : > { %s1930_s29 = scalar_select %p27_p4, %s1744_s17, %s29_s27  }
  0x5b   : > { %p38_p10 = por %p37_p13, %p36_p8  ;;  %p1934_p5 = por %p2148_p3, %p36_p8 }
  0x5c   : > { %s194_s26 = sand.u32 1, %s1744_s17   ;;  %s1310_s5 = sshll.u32 %s1748_s18, 10 }
  0x5d   : > { %s1220_s24 = sshll.u32 %s194_s26, 6  ;;  %s1943_s25 = scalar_lea.hbm %s2135_s0, %s1310_s5 }
  0x5e   : > { %s198_s28 = scalar_lea.vmem [#allocation2], %s1220_s24  ;;  %p1945_p11 = pnand %p1379_p6, %p38_p10 }
  0x5f   : > { %s205_s9 = sshll.u32 %s198_s28, 4  ;;  %s1951_s10 = scalar_lea.sflag [#allocation3], %s194_s26  ;;  %s1949_s9 = int_to_ptr.vmem [resolvable:$true] %s205_s9 }
  0x60   : > { %s1644_s11 = scalar_lea.hbm %s1943_s25, 1024  ;;  %p1646_p9 = pneg %p1945_p11 }
  0x61   : > { %p1645_p7 = scmp.ne.s32.totalorder %s1943_s25, %s1644_s11  ;;  %s1649_s5 = scalar_lea.hbm %s2135_s0, 2048 }
  0x62   : > { %p1650_p1 = scmp.lt.u32.totalorder %s1943_s25, %s2135_s0  ;;  %p1651_p2 = scmp.lt.u32.totalorder %s1649_s5, %s1644_s11 }
  0x63   : > { %p1647_p12 = pnand %p1646_p9, %p1645_p7  ;;  %p1653_p8 = scmp.lt.u32.totalorder %s1644_s11, %s1943_s25 }
  0x64   : > { %p1652_p4 = por %p1651_p2, %p1650_p1 }
  0x65   : > { %p1648_p0 = pneg %p1647_p12 }
  0x66   : > { %p1654_p13 = por %p1653_p8, %p1652_p4 }
  0x68   : > { %p1655_p6 = pnand %p1654_p13, %p1648_p0 }
  0x6a   : > { %1658 = shalt.err (!%p1655_p6)
}
  0x6b   : > { %s1659_s26 = scalar_lea.vmem %s1949_s9, 1024  ;;  %s1759_s7 = smov [#allocation2]  }
  0x6c   : > { %p1660_p10 = scmp.ne.s32.totalorder %s1949_s9, %s1659_s26  ;;  %s1664_s28 = sshll.u32 %s1759_s7, 4  ;;  %s1665_s28 = int_to_ptr.vmem [resolvable:$false] %s1664_s28 }
  0x6d   : > { %s1666_s20 = scalar_lea.vmem %s1665_s28, 2048  ;;  %p1667_p12 = scmp.lt.s32.totalorder %s1949_s9, %s1665_s28 }
  0x6e   : > { %p1662_p3 = pnand %p1660_p10, %p1646_p9  ;;  %p1668_p1 = scmp.lt.s32.totalorder %s1666_s20, %s1659_s26 }
  0x70   : > { %p1663_p7 = pneg %p1662_p3  ;;  %p1669_p2 = por %p1668_p1, %p1667_p12 }
  0x72   : > { %p1670_p4 = pnand %p1669_p2, %p1663_p7 }
  0x74   : > { %1673 = shalt.err (!%p1670_p4)
}
  0x75   : > { %1371 = dma.hbm_to_vmem [thread:$0]  (!%p1945_p11), %s1943_s25, 1024, %s1949_s9, %s1951_s10, %s1752_s12, %s1752_s12, %s1753_s13  }
  0x76   : > { %p2151_p9 = scmp.ne.s32.totalorder %s2145_s23, 0 }
  0x77   : > { %s1985_s11 = sand.u32 (!%p2151_p9), 1, %s1740_s16   ;;  %p2152_p0 = scmp.ne.s32.totalorder (!%p2151_p9), %s2143_s21, 0 }
  0x78   : > { %217 = sbr.rel (%p2151_p9) target bundleno = 1217 (0x4c1), region = 36  ;;  %s1224_s27 = sshll.u32 (!%p2151_p9), %s1985_s11, 6 }
  0x79   : > { %s220_s5 = scalar_lea.sflag (!%p2151_p9), [#allocation3], %s1985_s11  ;;  %s1991_s8 = scalar_lea.vmem (!%p2151_p9), [#allocation2], %s1224_s27 }
  0x7f   : > { %1719 = dma.done.wait (%p2152_p0), %s220_s5, 1024  }
  0x80   : > { %1721 = vsyncadd (%p2152_p0), %s220_s5, 4294966272  ;;  %p2153_p11 = scmp.eq.s32.totalorder %s1810_s19, 0 }
  0x82   : > { %1723 = dma.done.wait (%p2153_p11), [#allocation6], 8704   ;;  %p2154_p8 = pmov %p2153_p11 }
  0x84   : > { %1725 = vsyncadd (%p2154_p8), [#allocation6], 4294958592  ;;  %p2155_p13 = pmov %p2154_p8 }
  0x85   : > { %p2156_p6 = pmov %p2154_p8 }
  0x86   : > { %1727 = dma.done.wait (%p2155_p13), [#allocation9], 256  }
  0x87   : > { %1729 = vsyncadd (%p2156_p6), [#allocation9], 4294967040  ;;  %v1430_v0 = vld [vmem:[#allocation5 + $0x4] ss:$16 sps:$4 sm:$0xff]   ;;  %v1432_v1 = vld [vmem:[#allocation5 + $0xc] ss:$16 sps:$4 sm:$0xff]  }
  0x88   : > { %657 = vmatprep.subr.bf16.mxu0 %v1430_v0  ;;  %v1434_v2 = vld [vmem:[#allocation5] ss:$16 sps:$4 sm:$0xff]   ;;  %v1435_v3 = vld [vmem:[#allocation5 + $0x8] ss:$16 sps:$4 sm:$0xff]   ;;  %710 = vmatprep.subr.bf16.mxu1 %v1432_v1  ;;  %v1436_v4 = vld [vmem:[#allocation5 + $0x24] ss:$16 sps:$4 sm:$0xff]  }
  0x89   : > { %658 = vmatpush1.bf16.msra.mxu0 %v1434_v2  ;;  %711 = vmatpush1.bf16.msra.mxu1 %v1435_v3  ;;  %v1438_v5 = vld [vmem:[#allocation5 + $0x2c] ss:$16 sps:$4 sm:$0xff]   ;;  %v1440_v6 = vld [vmem:[#allocation5 + $0x20] ss:$16 sps:$4 sm:$0xff]   ;;  %v1441_v7 = vld [vmem:[#allocation5 + $0x28] ss:$16 sps:$4 sm:$0xff]  }
  0x8a   : > { %659 = vmatprep.subr.bf16.mxu0 %v1436_v4  ;;  %712 = vmatprep.subr.bf16.mxu1 %v1438_v5  ;;  %v1442_v8 = vld [vmem:[#allocation5 + $0x44] ss:$16 sps:$4 sm:$0xff]   ;;  %v1444_v9 = vld [vmem:[#allocation5 + $0x4c] ss:$16 sps:$4 sm:$0xff]   ;;  %v1446_v10 = vld [vmem:[#allocation5 + $0x40] ss:$16 sps:$4 sm:$0xff]  }
  0x8b   : > { %v1447_v11 = vld [vmem:[#allocation5 + $0x48] ss:$16 sps:$4 sm:$0xff]   ;;  %v1448_v12 = vld [vmem:[#allocation5 + $0x64] ss:$16 sps:$4 sm:$0xff]   ;;  %v1450_v13 = vld [vmem:[#allocation5 + $0x6c] ss:$16 sps:$4 sm:$0xff]  }
  0x8c   : > { %v1452_v14 = vld [vmem:[#allocation5 + $0x60] ss:$16 sps:$4 sm:$0xff]   ;;  %v1453_v15 = vld [vmem:[#allocation5 + $0x68] ss:$16 sps:$4 sm:$0xff]   ;;  %v1454_v16 = vld [vmem:[#allocation5 + $0x84] ss:$16 sps:$4 sm:$0xff]  }
  0x8d   : > { %660 = vmatpush1.bf16.msra.mxu0 %v1440_v6  ;;  %713 = vmatpush1.bf16.msra.mxu1 %v1441_v7  ;;  %v1456_v17 = vld [vmem:[#allocation5 + $0x8c] ss:$16 sps:$4 sm:$0xff]   ;;  %v1458_v18 = vld [vmem:[#allocation5 + $0x80] ss:$16 sps:$4 sm:$0xff]   ;;  %v1459_v19 = vld [vmem:[#allocation5 + $0x88] ss:$16 sps:$4 sm:$0xff]  }
  0x8e   : > { %661 = vmatprep.subr.bf16.mxu0 %v1442_v8  ;;  %714 = vmatprep.subr.bf16.mxu1 %v1444_v9  ;;  %v1460_v20 = vld [vmem:[#allocation5 + $0xa4] ss:$16 sps:$4 sm:$0xff]   ;;  %v1462_v21 = vld [vmem:[#allocation5 + $0xac] ss:$16 sps:$4 sm:$0xff]   ;;  %v1464_v22 = vld [vmem:[#allocation5 + $0xa0] ss:$16 sps:$4 sm:$0xff]  }
  0x8f   : > { %v1465_v23 = vld [vmem:[#allocation5 + $0xa8] ss:$16 sps:$4 sm:$0xff]   ;;  %v1466_v24 = vld [vmem:[#allocation5 + $0xc4] ss:$16 sps:$4 sm:$0xff]   ;;  %v1468_v25 = vld [vmem:[#allocation5 + $0xcc] ss:$16 sps:$4 sm:$0xff]  }
  0x90   : > { %v1470_v26 = vld [vmem:[#allocation5 + $0xc0] ss:$16 sps:$4 sm:$0xff]   ;;  %v1471_v27 = vld [vmem:[#allocation5 + $0xc8] ss:$16 sps:$4 sm:$0xff]   ;;  %v1472_v28 = vld [vmem:[#allocation5 + $0xe4] ss:$16 sps:$4 sm:$0xff]  }
  0x91   : > { %662 = vmatpush1.bf16.msra.mxu0 %v1446_v10  ;;  %715 = vmatpush1.bf16.msra.mxu1 %v1447_v11  ;;  %v1474_v29 = vld [vmem:[#allocation5 + $0xec] ss:$16 sps:$4 sm:$0xff]   ;;  %v1476_v30 = vld [vmem:[#allocation5 + $0xe0] ss:$16 sps:$4 sm:$0xff]   ;;  %v1477_v31 = vld [vmem:[#allocation5 + $0xe8] ss:$16 sps:$4 sm:$0xff]  }
  0x92   : > { %663 = vmatprep.subr.bf16.mxu0 %v1448_v12  ;;  %716 = vmatprep.subr.bf16.mxu1 %v1450_v13  ;;  %v1478_v32 = vld [vmem:[#allocation5 + $0x104] ss:$16 sps:$4 sm:$0xff]   ;;  %v1480_v33 = vld [vmem:[#allocation5 + $0x10c] ss:$16 sps:$4 sm:$0xff]   ;;  %v1482_v34 = vld [vmem:[#allocation5 + $0x100] ss:$16 sps:$4 sm:$0xff]  }
  0x93   : > { %v1483_v35 = vld [vmem:[#allocation5 + $0x108] ss:$16 sps:$4 sm:$0xff]   ;;  %v1484_v36 = vld [vmem:[#allocation5 + $0x124] ss:$16 sps:$4 sm:$0xff]   ;;  %v1486_v37 = vld [vmem:[#allocation5 + $0x12c] ss:$16 sps:$4 sm:$0xff]  }
  0x94   : > { %v1488_v38 = vld [vmem:[#allocation5 + $0x120] ss:$16 sps:$4 sm:$0xff]   ;;  %v1489_v39 = vld [vmem:[#allocation5 + $0x128] ss:$16 sps:$4 sm:$0xff]   ;;  %v1490_v40 = vld [vmem:[#allocation5 + $0x144] ss:$16 sps:$4 sm:$0xff]  }
  0x95   : > { %664 = vmatpush1.bf16.msra.mxu0 %v1452_v14  ;;  %717 = vmatpush1.bf16.msra.mxu1 %v1453_v15  ;;  %v1492_v41 = vld [vmem:[#allocation5 + $0x14c] ss:$16 sps:$4 sm:$0xff]   ;;  %v1494_v42 = vld [vmem:[#allocation5 + $0x140] ss:$16 sps:$4 sm:$0xff]   ;;  %v1495_v43 = vld [vmem:[#allocation5 + $0x148] ss:$16 sps:$4 sm:$0xff]  }
  0x96   : > { %665 = vmatprep.subr.bf16.mxu0 %v1454_v16  ;;  %718 = vmatprep.subr.bf16.mxu1 %v1456_v17  ;;  %v1496_v44 = vld [vmem:[#allocation5 + $0x164] ss:$16 sps:$4 sm:$0xff]   ;;  %v1498_v45 = vld [vmem:[#allocation5 + $0x16c] ss:$16 sps:$4 sm:$0xff]   ;;  %v1500_v48 = vld [vmem:[#allocation5 + $0x160] ss:$16 sps:$4 sm:$0xff]  }
  0x97   : > { %v2006_v46 = vld [vmem:[%s1991_s8 + $0x8] sm:$0xff]  ;;  %v2009_v47 = vld [vmem:[%s1991_s8 + $0x18] sm:$0xff]  ;;  %v1502_v50 = vld [vmem:[#allocation5 + $0x184] ss:$16 sps:$4 sm:$0xff]   ;;  %s259_s21 = scalar_lea.vmem [#allocation10], %s1224_s27  ;;  %s1311_s12 = sshll.u32 %s1810_s19, 10 }
  0x98   : > { %v1501_v49 = vld [vmem:[#allocation5 + $0x168] ss:$16 sps:$4 sm:$0xff]   ;;  %v270_v51 = vpack.c.bf16 %v2009_v47, %v2006_v46  ;;  %v1504_v52 = vld [vmem:[#allocation5 + $0x18c] ss:$16 sps:$4 sm:$0xff]   ;;  %v1506_v53 = vld [vmem:[#allocation5 + $0x180] ss:$16 sps:$4 sm:$0xff]   ;;  %s2091_s9 = scalar_lea.hbm %s2139_s4, %s1311_s12 }
  0x99   : > { %666 = vmatpush1.bf16.msra.mxu0 %v1458_v18  ;;  %719 = vmatpush1.bf16.msra.mxu1 %v1459_v19  ;;  %v1507_v54 = vld [vmem:[#allocation5 + $0x188] ss:$16 sps:$4 sm:$0xff]   ;;  %v1508_v55 = vld [vmem:[#allocation5 + $0x1a4] ss:$16 sps:$4 sm:$0xff]   ;;  %v1510_v56 = vld [vmem:[#allocation5 + $0x1ac] ss:$16 sps:$4 sm:$0xff]  }
  0x9a   : > { %667 = vmatprep.subr.bf16.mxu0 %v1460_v20  ;;  %720 = vmatprep.subr.bf16.mxu1 %v1462_v21  ;;  %v1512_v57 = vld [vmem:[#allocation5 + $0x1a0] ss:$16 sps:$4 sm:$0xff]   ;;  %v1513_v58 = vld [vmem:[#allocation5 + $0x1a8] ss:$16 sps:$4 sm:$0xff]   ;;  %v1514_v59 = vld [vmem:[#allocation5 + $0x1c4] ss:$16 sps:$4 sm:$0xff]  }
  0x9b   : > { %689 = vmatprep.mubr.bf16.mxu0 %v270_v51  ;;  %742 = vmatprep.mubr.bf16.mxu1 %v270_v51  ;;  %v1516_v60 = vld [vmem:[#allocation5 + $0x1cc] ss:$16 sps:$4 sm:$0xff]   ;;  %v1518_v61 = vld [vmem:[#allocation5 + $0x1c0] ss:$16 sps:$4 sm:$0xff]   ;;  %v1519_v62 = vld [vmem:[#allocation5 + $0x1c8] ss:$16 sps:$4 sm:$0xff]  }
  0x9c   : > { %v1520_v63 = vld [vmem:[#allocation5 + $0x1e4] ss:$16 sps:$4 sm:$0xff]   ;;  %v1522_v0 = vld [vmem:[#allocation5 + $0x1ec] ss:$16 sps:$4 sm:$0xff]   ;;  %v1524_v1 = vld [vmem:[#allocation5 + $0x1e0] ss:$16 sps:$4 sm:$0xff]  }
  0x9d   : > { %668 = vmatpush1.bf16.msra.mxu0 %v1464_v22  ;;  %721 = vmatpush1.bf16.msra.mxu1 %v1465_v23  ;;  %v1525_v2 = vld [vmem:[#allocation5 + $0x1e8] ss:$16 sps:$4 sm:$0xff]   ;;  %v2014_v3 = vld [vmem:[%s1991_s8] sm:$0xff]  ;;  %v2017_v4 = vld [vmem:[%s1991_s8 + $0x10] sm:$0xff]  ;;  %s1112_s23 = sshll.u32 %s259_s21, 4  ;;  %s1099_s10 = scalar_lea.sflag [#allocation4], %s1985_s11  ;;  %s2086_s23 = int_to_ptr.vmem [resolvable:$true] %s1112_s23 }
  0x9e   : > { %669 = vmatprep.subr.bf16.mxu0 %v1466_v24  ;;  %722 = vmatprep.subr.bf16.mxu1 %v1468_v25  ;;  %v2020_v5 = vld [vmem:[%s1991_s8 + $0x28] sm:$0xff]  ;;  %v2023_v6 = vld [vmem:[%s1991_s8 + $0x38] sm:$0xff]  ;;  %v269_v7 = vpack.c.bf16 %v2017_v4, %v2014_v3  ;;  %v2030_v9 = vld [vmem:[%s1991_s8 + $0x20] sm:$0xff]  ;;  %s1674_s19 = scalar_lea.vmem %s2086_s23, 1024  ;;  %s1761_s24 = smov [#allocation10]  }
  0x9f   : > { %v272_v8 = vpack.c.bf16 %v2023_v6, %v2020_v5  ;;  %v2033_v10 = vld [vmem:[%s1991_s8 + $0x30] sm:$0xff]  ;;  %p1675_p10 = scmp.ne.s32.totalorder %s2086_s23, %s1674_s19  ;;  %s1678_s6 = sshll.u32 %s1761_s24, 4  ;;  %s1679_s6 = int_to_ptr.vmem [resolvable:$false] %s1678_s6 }
  0xa0   : > { %v271_v11 = vpack.c.bf16 %v2033_v10, %v2030_v9  ;;  %s1680_s26 = scalar_lea.vmem %s1679_s6, 2048  ;;  %p1681_p12 = scmp.lt.s32.totalorder %s2086_s23, %s1679_s6 }
  0xa1   : > { %670 = vmatpush1.bf16.msra.mxu0 %v1470_v26  ;;  %723 = vmatpush1.bf16.msra.mxu1 %v1471_v27  ;;  %p1676_p3 = pnand %p1675_p10, %p1934_p5  ;;  %p1682_p1 = scmp.lt.s32.totalorder %s1680_s26, %s1674_s19 }
  0xa2   : > { %671 = vmatprep.subr.bf16.mxu0 %v1472_v28  ;;  %724 = vmatprep.subr.bf16.mxu1 %v1474_v29 }
  0xa3   : > { %p1677_p7 = pneg %p1676_p3  ;;  %p1683_p2 = por %p1682_p1, %p1681_p12 }
  0xa5   : > { %672 = vmatpush1.bf16.msra.mxu0 %v1476_v30  ;;  %725 = vmatpush1.bf16.msra.mxu1 %v1477_v31  ;;  %p1684_p4 = pnand %p1683_p2, %p1677_p7 }
  0xa6   : > { %673 = vmatprep.subr.bf16.mxu0 %v1478_v32  ;;  %726 = vmatprep.subr.bf16.mxu1 %v1480_v33 }
  0xa9   : > { %674 = vmatpush1.bf16.msra.mxu0 %v1482_v34  ;;  %727 = vmatpush1.bf16.msra.mxu1 %v1483_v35 }
  0xaa   : > { %675 = vmatprep.subr.bf16.mxu0 %v1484_v36  ;;  %728 = vmatprep.subr.bf16.mxu1 %v1486_v37 }
  0xad   : > { %676 = vmatpush1.bf16.msra.mxu0 %v1488_v38  ;;  %729 = vmatpush1.bf16.msra.mxu1 %v1489_v39 }
  0xae   : > { %677 = vmatprep.subr.bf16.mxu0 %v1490_v40  ;;  %730 = vmatprep.subr.bf16.mxu1 %v1492_v41 }
  0xb1   : > { %678 = vmatpush1.bf16.msra.mxu0 %v1494_v42  ;;  %731 = vmatpush1.bf16.msra.mxu1 %v1495_v43 }
  0xb2   : > { %679 = vmatprep.subr.bf16.mxu0 %v1496_v44  ;;  %732 = vmatprep.subr.bf16.mxu1 %v1498_v45 }
  0xb5   : > { %680 = vmatpush1.bf16.msra.mxu0 %v1500_v48  ;;  %733 = vmatpush1.bf16.msra.mxu1 %v1501_v49 }
  0xb6   : > { %681 = vmatprep.subr.bf16.mxu0 %v1502_v50  ;;  %734 = vmatprep.subr.bf16.mxu1 %v1504_v52 }
  0xb9   : > { %682 = vmatpush1.bf16.msra.mxu0 %v1506_v53  ;;  %735 = vmatpush1.bf16.msra.mxu1 %v1507_v54 }
  0xba   : > { %683 = vmatprep.subr.bf16.mxu0 %v1508_v55  ;;  %736 = vmatprep.subr.bf16.mxu1 %v1510_v56 }
  0xbd   : > { %684 = vmatpush1.bf16.msra.mxu0 %v1512_v57  ;;  %737 = vmatpush1.bf16.msra.mxu1 %v1513_v58 }
  0xbe   : > { %685 = vmatprep.subr.bf16.mxu0 %v1514_v59  ;;  %738 = vmatprep.subr.bf16.mxu1 %v1516_v60 }
  0xc1   : > { %686 = vmatpush1.bf16.msra.mxu0 %v1518_v61  ;;  %739 = vmatpush1.bf16.msra.mxu1 %v1519_v62 }
  0xc2   : > { %687 = vmatprep.subr.bf16.mxu0 %v1520_v63  ;;  %740 = vmatprep.subr.bf16.mxu1 %v1522_v0 }
  0xc5   : > { %688 = vmatpush1.bf16.msra.mxu0 %v1524_v1  ;;  %741 = vmatpush1.bf16.msra.mxu1 %v1525_v2 }
  0xc8   : > { %690 = vmatmul.mubr.bf16.vlgmr.msra.gmra.mrb[0].mxu0 %v269_v7  ;;  %743 = vmatmul.mubr.bf16.vlgmr.msra.gmra.mrb[0].mxu1 %v269_v7 }
  0xc9   : > { %699 = vmatprep.mubr.bf16.mxu0 %v272_v8  ;;  %752 = vmatprep.mubr.bf16.mxu1 %v272_v8 }
  0xd0   : > { %700 = vmatmul.mubr.bf16.gmra.mrb[4].mxu0 %v271_v11  ;;  %753 = vmatmul.mubr.bf16.gmra.mrb[4].mxu1 %v271_v11 }
 0x19b   : > { %v691_v12 = vpop.f32.mrb[0].mxu0  ;;  %v744_v13 = vpop.f32.mrb[0].mxu1 }
 0x19c   : > { %v763_v14 = vmul.f32 %v691_v12, %v691_v12  ;;  %v771_v15 = vmul.f32 %v744_v13, %v744_v13  ;;  %v693_v16 = vpop.f32.mrb[1].mxu0  ;;  %v746_v17 = vpop.f32.mrb[1].mxu1 }
 0x19d   : > { %v764_v18 = vmul.f32 %v693_v16, %v693_v16  ;;  %v772_v19 = vmul.f32 %v746_v17, %v746_v17  ;;  %v695_v20 = vpop.f32.mrb[2].mxu0  ;;  %v748_v21 = vpop.f32.mrb[2].mxu1 }
 0x19e   : > { %v779_v22 = vadd.f32 %v771_v15, %v763_v14  ;;  %v765_v23 = vmul.f32 %v695_v20, %v695_v20  ;;  %v773_v24 = vmul.f32 %v748_v21, %v748_v21  ;;  %v697_v25 = vpop.f32.mrb[3].mxu0  ;;  %v750_v26 = vpop.f32.mrb[3].mxu1 }
 0x19f   : > { %v780_v27 = vadd.f32 %v772_v19, %v764_v18  ;;  %v766_v28 = vmul.f32 %v697_v25, %v697_v25  ;;  %v774_v29 = vmul.f32 %v750_v26, %v750_v26 }
 0x1a0   : > { %v781_v30 = vadd.f32 %v773_v24, %v765_v23  ;;  %1528 = vrsqrt.f32 %v779_v22  ;;  %vm789_vm0 = vcmp.eq.f32.partialorder %v779_v22, inf  ;;  %vm791_vm1 = vcmp.eq.f32.partialorder %v779_v22, 0.0 }
 0x1a1   : > { %v782_v31 = vadd.f32 %v774_v29, %v766_v28  ;;  %1530 = vrsqrt.f32 %v780_v27  ;;  %v792_v57 = vand.u32 2147483648, %v779_v22  ;;  %vm796_vm2 = vcmp.eq.f32.partialorder %v780_v27, inf }
 0x1a2   : > { %1532 = vrsqrt.f32 %v781_v30  ;;  %vm798_vm3 = vcmp.eq.f32.partialorder %v780_v27, 0.0  ;;  %v799_v60 = vand.u32 2147483648, %v780_v27  ;;  %vm803_vm4 = vcmp.eq.f32.partialorder %v781_v30, inf }
 0x1a3   : > { %v701_v32 = vpop.f32.mrb[4].mxu0  ;;  %v754_v33 = vpop.f32.mrb[4].mxu1  ;;  %1534 = vrsqrt.f32 %v782_v31  ;;  %vm805_vm5 = vcmp.eq.f32.partialorder %v781_v30, 0.0  ;;  %v806_v2 = vand.u32 2147483648, %v781_v30  ;;  %vm810_vm6 = vcmp.eq.f32.partialorder %v782_v31, inf }
 0x1a4   : > { %v767_v34 = vmul.f32 %v701_v32, %v701_v32  ;;  %v775_v35 = vmul.f32 %v754_v33, %v754_v33  ;;  %v703_v36 = vpop.f32.mrb[5].mxu0  ;;  %v756_v37 = vpop.f32.mrb[5].mxu1  ;;  %v813_v12 = vand.u32 2147483648, %v782_v31  ;;  %vm812_vm7 = vcmp.eq.f32.partialorder %v782_v31, 0.0 }
 0x1a5   : > { %v768_v38 = vmul.f32 %v703_v36, %v703_v36  ;;  %v776_v39 = vmul.f32 %v756_v37, %v756_v37  ;;  %v705_v40 = vpop.f32.mrb[6].mxu0  ;;  %v758_v41 = vpop.f32.mrb[6].mxu1 }
 0x1a6   : > { %v2037_v42 = vadd.f32 %v775_v35, %v767_v34  ;;  %v769_v43 = vmul.f32 %v705_v40, %v705_v40  ;;  %v777_v44 = vmul.f32 %v758_v41, %v758_v41  ;;  %v707_v45 = vpop.f32.mrb[7].mxu0  ;;  %v760_v48 = vpop.f32.mrb[7].mxu1  ;;  %v859_v40 = vld [vmem:[#allocation7] sm:$0xff] }
 0x1a7   : > { %v2039_v49 = vadd.f32 %v776_v39, %v768_v38  ;;  %v770_v50 = vmul.f32 %v707_v45, %v707_v45  ;;  %v778_v51 = vmul.f32 %v760_v48, %v760_v48 }
 0x1a8   : > { %v2041_v52 = vadd.f32 %v777_v44, %v769_v43  ;;  %1536 = vrsqrt.f32 %v2037_v42  ;;  %vm817_vm8 = vcmp.eq.f32.partialorder %v2037_v42, inf  ;;  %vm819_vm9 = vcmp.eq.f32.partialorder %v2037_v42, 0.0 }
 0x1a9   : > { %v2044_v53 = vadd.f32 %v778_v51, %v770_v50  ;;  %1538 = vrsqrt.f32 %v2039_v49  ;;  %v820_v21 = vand.u32 2147483648, %v2037_v42  ;;  %vm824_vm10 = vcmp.eq.f32.partialorder %v2039_v49, inf }
 0x1aa   : > { %v1529_v54 = vpop.eup %1528  ;;  %1540 = vrsqrt.f32 %v2041_v52  ;;  %vm826_vm11 = vcmp.eq.f32.partialorder %v2039_v49, 0.0  ;;  %v827_v24 = vand.u32 2147483648, %v2039_v49  ;;  %vm831_vm12 = vcmp.eq.f32.partialorder %v2041_v52, inf }
 0x1ab   : > { %v1531_v55 = vpop.eup %1530  ;;  %v788_v56 = vmul.f32 %v1529_v54, %v779_v22  ;;  %1542 = vrsqrt.f32 %v2044_v53  ;;  %vm833_vm13 = vcmp.eq.f32.partialorder %v2041_v52, 0.0  ;;  %vm838_vm14 = vcmp.eq.f32.partialorder %v2044_v53, inf  ;;  %v861_v54 = vld [vmem:[#allocation7 + $0x10] sm:$0xff] }
 0x1ac   : > { %v1533_v58 = vpop.eup %1532  ;;  %v795_v59 = vmul.f32 %v1531_v55, %v780_v27  ;;  %v841_v34 = vand.u32 2147483648, %v2044_v53  ;;  %vm840_vm15 = vcmp.eq.f32.partialorder %v2044_v53, 0.0  ;;  %v862_v55 = vld [vmem:[#allocation7 + $0x18] sm:$0xff] }
 0x1ad   : > { %v1535_v61 = vpop.eup %1534  ;;  %v790_v62 = vsel %vm789_vm0, %v779_v22, %v788_v56  ;;  %v802_v63 = vmul.f32 %v1533_v58, %v781_v30  ;;  %vm863_vm0 = vcmask 261120   ;;  %v1760_v56 = vmov 0  }
 0x1ae   : > { %v793_v0 = vsel %vm791_vm1, %v792_v57, %v790_v62  ;;  %v797_v1 = vsel %vm796_vm2, %v780_v27, %v795_v59  ;;  %v809_v7 = vmul.f32 %v1535_v61, %v782_v31  ;;  %1328 = vmatprep.mubr.msk.f32.mxu0 %vm863_vm0, %v859_v40  ;;  %1429 = vset.pattern.permute.xlu1 %v1760_v56 }
 0x1af   : > { %v800_v8 = vsel %vm798_vm3, %v799_v60, %v797_v1  ;;  %v804_v11 = vsel %vm803_vm4, %v781_v30, %v802_v63  ;;  %v834_v30 = vand.u32 2147483648, %v2041_v52  ;;  %1428 = vset.pattern.permute.xlu0 %v1760_v56  ;;  %1069 = vmatprep.mubr.bf16.mxu1 %v1760_v56 }
 0x1b0   : > { %v843_v13 = vadd.f32 %v800_v8, %v793_v0  ;;  %v807_v14 = vsel %vm805_vm5, %v806_v2, %v804_v11  ;;  %v811_v15 = vsel %vm810_vm6, %v782_v31, %v809_v7 }
 0x1b1   : > { %v814_v16 = vsel %vm812_vm7, %v813_v12, %v811_v15 }
 0x1b2   : > { %v1537_v17 = vpop.eup %1536  ;;  %844 = vadd.xlane.f32.xlu0 %v843_v13  ;;  %v846_v18 = vadd.f32 %v814_v16, %v807_v14 }
 0x1b3   : > { %v1539_v19 = vpop.eup %1538  ;;  %v816_v20 = vmul.f32 %v1537_v17, %v2037_v42 }
 0x1b4   : > { %v1541_v22 = vpop.eup %1540  ;;  %v823_v23 = vmul.f32 %v1539_v19, %v2039_v49 }
 0x1b5   : > { %v1543_v25 = vpop.eup %1542  ;;  %v818_v26 = vsel %vm817_vm8, %v2037_v42, %v816_v20  ;;  %v830_v27 = vmul.f32 %v1541_v22, %v2041_v52 }
 0x1b6   : > { %847 = vadd.xlane.f32.xlu0 %v846_v18  ;;  %v821_v28 = vsel %vm819_vm9, %v820_v21, %v818_v26  ;;  %v825_v29 = vsel %vm824_vm10, %v2039_v49, %v823_v23  ;;  %v837_v31 = vmul.f32 %v1543_v25, %v2044_v53 }
 0x1b7   : > { %v828_v32 = vsel %vm826_vm11, %v827_v24, %v825_v29  ;;  %v832_v33 = vsel %vm831_vm12, %v2041_v52, %v830_v27 }
 0x1b8   : > { %v849_v35 = vadd.f32 %v828_v32, %v821_v28  ;;  %v835_v36 = vsel %vm833_vm13, %v834_v30, %v832_v33  ;;  %v839_v37 = vsel %vm838_vm14, %v2044_v53, %v837_v31  ;;  %v860_v53 = vld [vmem:[#allocation7 + $0x8] sm:$0xff] }
 0x1b9   : > { %v842_v38 = vsel %vm840_vm15, %v841_v34, %v839_v37 }
 0x1ba   : > { %850 = vadd.xlane.f32.xlu1 %v849_v35  ;;  %v852_v39 = vadd.f32 %v842_v38, %v835_v36 }
 0x1be   : > { %853 = vadd.xlane.f32.xlu1 %v852_v39 }
 0x23f   : > { %v845_v41 = vpop.xlane.xlu0 %844 }
 0x240   : > { %v855_v43 = vmul.f32 0.00390625, %v845_v41 }
 0x243   : > { %v848_v42 = vpop.xlane.xlu0 %847 }
 0x244   : > { %v856_v44 = vmul.f32 0.00390625, %v848_v42 }
 0x246   : > { %v1334_v45 = vpack.c.bf16 %v856_v44, %v855_v43 }
 0x247   : > { %v851_v48 = vpop.xlane.xlu1 %850 }
 0x248   : > { %1335 = vmatprep.subr.bf16.mxu0 %v1334_v45  ;;  %v857_v50 = vmul.f32 0.00390625, %v851_v48 }
 0x249   : > { %1337 = vmatpush3.bf16.msra.mxu0 %v1334_v45 }
 0x24b   : > { %v854_v49 = vpop.xlane.xlu1 %853 }
 0x24c   : > { %v858_v51 = vmul.f32 0.00390625, %v854_v49 }
 0x24e   : > { %v1338_v52 = vpack.c.bf16 %v858_v51, %v857_v50 }
 0x250   : > { %1339 = vmatprep.subr.bf16.mxu0 %v1338_v52 }
 0x251   : > { %1341 = vmatpush3.bf16.msra.mxu0 %v1338_v52 }
 0x254   : > { %1329 = vmatmul.mubr.msk.f32.vlgmr.msra.gmra.mrb[8].mxu0 %vm863_vm0, %v860_v53 }
 0x255   : > { %1331 = vmatprep.mubr.msk.f32.mxu0 %vm863_vm0, %v861_v54 }
 0x258   : > { %1332 = vmatmul.mubr.msk.f32.gmra.mrb[10].mxu0 %vm863_vm0, %v862_v55 }
 0x327   : > { %v1330_v57 = vpop.f32.mrb[8].mxu0 }
 0x328   : > { %v1298_v58 = vmul.f32 -1.442695, %v1330_v57  ;;  %v942_v59 = vpop.f32.mrb[9].mxu0 }
 0x329   : > { %v1297_v60 = vmul.f32 -1.442695, %v942_v59 }
 0x32a   : > { %1544 = vpow2.f32 %v1298_v58 }
 0x32b   : > { %1546 = vpow2.f32 %v1297_v60  ;;  %v1333_v61 = vpop.f32.mrb[10].mxu0 }
 0x32c   : > { %v1300_v62 = vmul.f32 -1.442695, %v1333_v61  ;;  %v952_v63 = vpop.f32.mrb[11].mxu0 }
 0x32d   : > { %v1299_v0 = vmul.f32 -1.442695, %v952_v63 }
 0x32e   : > { %1548 = vpow2.f32 %v1300_v62 }
 0x32f   : > { %1550 = vpow2.f32 %v1299_v0 }
 0x334   : > { %v1545_v1 = vpop.eup %1544 }
 0x335   : > { %v1547_v2 = vpop.eup %1546  ;;  %v974_v7 = vadd.f32 1.0, %v1545_v1 }
 0x336   : > { %v973_v8 = vadd.f32 1.0, %v1547_v2 }
 0x337   : > { %1552 = vrcp.f32 %v974_v7 }
 0x338   : > { %v1549_v11 = vpop.eup %1548  ;;  %1554 = vrcp.f32 %v973_v8 }
 0x339   : > { %v1551_v12 = vpop.eup %1550  ;;  %v976_v14 = vadd.f32 1.0, %v1549_v11 }
 0x33a   : > { %v975_v13 = vadd.f32 1.0, %v1551_v12 }
 0x33c   : > { %1556 = vrcp.f32 %v975_v13 }
 0x33d   : > { %1558 = vrcp.f32 %v976_v14 }
 0x341   : > { %v1553_v15 = vpop.eup %1552 }
 0x342   : > { %v1555_v16 = vpop.eup %1554  ;;  %992 = vperm.xlu1 %1429, %v1553_v15  }
 0x343   : > { %987 = vperm.xlu0 %1428, %v1555_v16  }
 0x346   : > { %v1557_v17 = vpop.eup %1556 }
 0x347   : > { %997 = vperm.xlu1 %1429, %v1557_v17   ;;  %v1559_v18 = vpop.eup %1558 }
 0x34b   : > { %1002 = vperm.xlu1 %1429, %v1559_v18  }
 0x3c1   : > { %v993_v19 = vpop.permute.xlu1 %992 }
 0x3c2   : > { %v1007_v20 = vmul.f32 %v993_v19, %v2017_v4  ;;  %v1008_v21 = vmul.f32 %v993_v19, %v2009_v47  ;;  %v988_v22 = vpop.permute.xlu0 %987 }
 0x3c3   : > { %v1005_v23 = vmul.f32 %v988_v22, %v2014_v3  ;;  %v1006_v24 = vmul.f32 %v988_v22, %v2006_v46  ;;  %v1526_v3 = vld [vmem:[#allocation8] sm:$0xff]   ;;  %v1527_v46 = vld [vmem:[#allocation8 + $0x8] sm:$0xff]  }
 0x3c5   : > { %v1017_v25 = vpack.c.bf16 %v1007_v20, %v1005_v23  ;;  %v1018_v26 = vpack.c.bf16 %v1008_v21, %v1006_v24 }
 0x3c6   : > { %v998_v27 = vpop.permute.xlu1 %997 }
 0x3c7   : > { %1037 = vmatprep.subr.bf16.mxu1 %v1018_v26  ;;  %v1009_v29 = vmul.f32 %v998_v27, %v2030_v9  ;;  %v1010_v30 = vmul.f32 %v998_v27, %v2020_v5 }
 0x3c8   : > { %1038 = vmatpush1.bf16.msra.mxu1 %v1017_v25 }
 0x3ca   : > { %v1003_v28 = vpop.permute.xlu1 %1002 }
 0x3cb   : > { %v1011_v4 = vmul.f32 %v1003_v28, %v2033_v10  ;;  %v1012_v47 = vmul.f32 %v1003_v28, %v2023_v6 }
 0x3cd   : > { %v1019_v31 = vpack.c.bf16 %v1011_v4, %v1009_v29  ;;  %v1020_v32 = vpack.c.bf16 %v1012_v47, %v1010_v30 }
 0x3cf   : > { %1039 = vmatprep.subr.bf16.mxu1 %v1020_v32 }
 0x3d0   : > { %1040 = vmatpush1.bf16.msra.mxu1 %v1019_v31 }
 0x3d3   : > { %1303 = vmatmul.mubr.msk.bf16.vlgmr.msra.gmra.mrb[8].mxu1 %vm863_vm0, %v1526_v3 }
 0x3d4   : > { %1079 = vmatprep.mubr.bf16.mxu1 %v1760_v56 }
 0x3db   : > { %1304 = vmatmul.mubr.msk.bf16.gmra.mrb[12].mxu1 %vm863_vm0, %v1527_v46 }
 0x4a6   : > { %v1071_v33 = vpop.f32.mrb[8].mxu1 }
 0x4a7   : > { %1090 = vst [vmem:[%s259_s21] sm:$0xff] %v1071_v33  ;;  %v1073_v5 = vpop.f32.mrb[9].mxu1 }
 0x4a8   : > { %1091 = vst [vmem:[%s259_s21 + $0x8] sm:$0xff] %v1073_v5  ;;  %v1075_v9 = vpop.f32.mrb[10].mxu1 }
 0x4a9   : > { %1092 = vst [vmem:[%s259_s21 + $0x10] sm:$0xff] %v1075_v9  ;;  %v1077_v6 = vpop.f32.mrb[11].mxu1 }
 0x4aa   : > { %1093 = vst [vmem:[%s259_s21 + $0x18] sm:$0xff] %v1077_v6 }
 0x4ae   : > { %v1081_v10 = vpop.f32.mrb[12].mxu1 }
 0x4af   : > { %1094 = vst [vmem:[%s259_s21 + $0x20] sm:$0xff] %v1081_v10  ;;  %v1083_v34 = vpop.f32.mrb[13].mxu1 }
 0x4b0   : > { %1095 = vst [vmem:[%s259_s21 + $0x28] sm:$0xff] %v1083_v34  ;;  %v1085_v35 = vpop.f32.mrb[14].mxu1 }
 0x4b1   : > { %1096 = vst [vmem:[%s259_s21 + $0x30] sm:$0xff] %v1085_v35  ;;  %v1087_v36 = vpop.f32.mrb[15].mxu1 }
 0x4b2   : > { %1097 = vst [vmem:[%s259_s21 + $0x38] sm:$0xff] %v1087_v36 }
 0x4b3   : > { %1687 = shalt.err (!%p1684_p4)
}
 0x4b4   : > { %s1688_s7 = scalar_lea.hbm %s2091_s9, 1024  ;;  %s1692_s27 = scalar_lea.hbm %s2139_s4, 2048 }
 0x4b5   : > { %p1689_p9 = scmp.ne.s32.totalorder %s2091_s9, %s1688_s7  ;;  %p1693_p8 = scmp.lt.u32.totalorder %s2091_s9, %s2139_s4 }
 0x4b6   : > { %p1694_p13 = scmp.lt.u32.totalorder %s1692_s27, %s1688_s7  ;;  %p1696_p10 = scmp.lt.u32.totalorder %s1688_s7, %s2091_s9 }
 0x4b7   : > { %p1690_p0 = pnand %p1689_p9, %p1934_p5 }
 0x4b8   : > { %p1695_p6 = por %p1694_p13, %p1693_p8 }
 0x4b9   : > { %p1691_p11 = pneg %p1690_p0 }
 0x4ba   : > { %p1697_p3 = por %p1696_p10, %p1695_p6 }
 0x4bc   : > { %p1698_p7 = pnand %p1697_p3, %p1691_p11 }
 0x4be   : > { %1701 = shalt.err (!%p1698_p7)
}
 0x4bf   : > { %s1762_s21 = smov 256   ;;  %s1763_s12 = smov 16  }
 0x4c0   : > { %1356 = dma.vmem_to_hbm [thread:$0]  (%p1934_p5), %s2086_s23, 1024, %s2091_s9, %s1099_s10, %s1762_s21, %s1762_s21, %s1763_s12  }
 0x4c1 PF: > { %s1127_s13 = sand.u32 1, %s1736_s15   ;;  %p2157_p12 = scmp.ne.s32.totalorder %s2144_s22, 0 }
 0x4c2   : > { %p2158_p1 = scmp.ge.s32.totalorder %s1748_s18, 2  ;;  %s1128_s25 = scalar_lea.sflag [#allocation4], %s1127_s13 }
 0x4c4   : > { %p1373_p2 = pnand %p2158_p1, %p2157_p12 }
 0x4c6   : > { %1731 = dma.done.wait (!%p1373_p2), %s1128_s25, 1024  }
 0x4c7   : > { %1733 = vsyncadd (!%p1373_p2), %s1128_s25, 4294966272  ;;  %p19_p4 = scmp.ge.s32.totalorder %s1920_s14, 4   ;;  %s2159_s15 = smov %s1740_s16 }
 0x4c8   : > { %s2160_s16 = smov %s1744_s17  ;;  %s2161_s17 = smov %s1930_s29 }
 0x4c9   : > { %s2162_s18 = smov %s1920_s14  ;;  %21 = sbr.rel (!%p19_p4) target bundleno = 7 (0x7), region = 93 }
 0x4d0   :  { %1133 = vsyncpa [#allocation3], 1 }
 0x4d1   :  { %1135 = vsyncpa [#allocation3 + $0x1], 1 }
 0x4d2   :  { %1136 = vsyncpa [#allocation6], 1 }
 0x4d3   :  { %1137 = vsyncpa [#allocation9], 1 }
 0x4d4   :  { %1138 = vsyncpa [#allocation4], 1 }
 0x4d5   :  { %1140 = vsyncpa [#allocation4 + $0x1], 1 }

</bundles_post_ra>
